<compile_context>
chip_gen: v7x
topology: tpu7x:2x2x1
jax: 0.10.0
libtpu: 0.0.40
codegen_flags: <defaults>
</compile_context>

<pallas_src>
import re

import jax
import jax.numpy as jnp
from jax.experimental import pallas as pl
from jax.experimental.pallas import tpu as pltpu


_LANE = 128
_BLOCK_BYTES_TARGET = 4 * 1024 * 1024   # ~4 MiB x-block per grid step
_SMALL_INPUT_BYTES = 1 << 20            # below this, plain XLA fusion wins


def _cdiv(a, b):
    return -(-a // b)


def _round_up(n, m):
    return ((n + m - 1) // m) * m


def _gcd(a, b):
    while b:
        a, b = b, a % b
    return a


def _tpu_generation():
    """Best-effort TPU generation (5/6/7/...); 0 if unknown."""
    try:
        kind = jax.devices()[0].device_kind.lower()
    except Exception:
        return 0
    m = re.search(r"(\d+)", kind)
    return int(m.group(1)) if m else 0


def _sublane(itemsize):
    if itemsize >= 4:
        return 8
    if itemsize == 2:
        return 16
    return 32   # native packed tile for 1-byte dtypes is (32, 128)


def _compute_dtype(dtype, gen):
    d = jnp.dtype(dtype)
    if d.itemsize >= 4:
        return dtype
    if d == jnp.bfloat16 and gen >= 6:
        return dtype          # native bf16 VPU on v6e / v7x
    return jnp.float32        # v5e (no bf16 VALU/EUP) and sub-16-bit dtypes


def _choose_layout(B, F):
    """Repack (B, F) -> (B//k, k*F) so the last dim is a multiple of 128
    without padding the big tensor.  Falls back to the original shape
    (full-dim feature block, masked stores) when no clean factor exists."""
    if F % _LANE == 0:
        return B, F, 1
    k = _LANE // _gcd(F, _LANE)          # smallest k with (k*F) % 128 == 0
    if k > 1 and B % k == 0:
        return B // k, k * F, k
    return B, F, 1


# ---------------------------------------------------------------------------
# Pallas kernel (elementwise hot path only; logabsdet is hoisted out)
# ---------------------------------------------------------------------------
def _make_affine_kernel(inverse, compute_dtype):
    def kernel(x_ref, a_ref, b_ref, y_ref):
        a = a_ref[...].astype(compute_dtype)      # (1, Fr) resident
        b = b_ref[...].astype(compute_dtype)      # (1, Fr) resident
        x = x_ref[...].astype(compute_dtype)      # (tb, Fr) pipelined
        if inverse:
            y = (x - b) * a                       # a == 1/scale (precomputed)
        else:
            y = x * a + b                         # a == scale
        y_ref[...] = y.astype(y_ref.dtype)
    return kernel


# ---------------------------------------------------------------------------
# Wrapper: lane-dense repack, batch tiling, pallas_call
# ---------------------------------------------------------------------------
def _affine_pallas(x, a_vec, b_vec, *, inverse, force_pallas=False):
    """y = (x - b) * a   if inverse else   y = x * a + b, per-feature a, b."""
    assert x.ndim == 2
    B, F = x.shape
    dtype = x.dtype
    itemsize = jnp.dtype(dtype).itemsize
    gen = _tpu_generation()

    # Small-input fast path: pallas_call launch overhead dwarfs the work.
    if not force_pallas and B * F * itemsize < _SMALL_INPUT_BYTES:
        a2 = a_vec[None, :]
        b2 = b_vec[None, :]
        y = (x - b2) * a2 if inverse else x * a2 + b2
        return y.astype(dtype)

    # Lane-dense repack (free reshape) or fallback to original shape; no pad.
    Br, Fr, kpack = _choose_layout(B, F)
    if kpack > 1:
        x_r = x.reshape(Br, Fr)
        a_r = jnp.tile(a_vec, kpack).reshape(1, Fr)
        b_r = jnp.tile(b_vec, kpack).reshape(1, Fr)
    else:
        x_r = x
        a_r = a_vec.reshape(1, Fr)
        b_r = b_vec.reshape(1, Fr)

    # Batch tile: ~4 MiB block target, multiple of the sublane granule, and
    # at least 2 grid steps when there are enough rows (v7x megacore).
    sub = _sublane(itemsize)
    row_bytes = Fr * itemsize
    tb = max(sub, (_BLOCK_BYTES_TARGET // row_bytes) // sub * sub)
    if Br >= 2 * sub:
        tb = min(tb, _round_up(_cdiv(Br, 2), sub))
    if tb >= Br:
        tb = Br                       # full-dim block (always legal)
    grid = (_cdiv(Br, tb),)           # ragged last block handled by Pallas

    # VMEM: double-buffered x & y blocks + resident params + headroom,
    # clamped per generation (v7x: 64 MiB physical / 32 MiB scoped default).
    vmem_bytes = 2 * 2 * tb * Fr * itemsize + 4 * Fr * 4 + (2 << 20)
    vmem_cap = (32 << 20) if gen >= 7 else (48 << 20)
    vmem_bytes = int(min(max(vmem_bytes, 4 << 20), vmem_cap))

    kernel = _make_affine_kernel(inverse, _compute_dtype(dtype, gen))

    y_r = pl.pallas_call(
        kernel,
        out_shape=jax.ShapeDtypeStruct((Br, Fr), dtype),
        grid_spec=pl.GridSpec(
            grid=grid,
            in_specs=[
                pl.BlockSpec((tb, Fr), lambda i: (i, 0)),   # x tile (pipelined)
                pl.BlockSpec((1, Fr), lambda i: (0, 0)),    # a (resident)
                pl.BlockSpec((1, Fr), lambda i: (0, 0)),    # b (resident)
            ],
            out_specs=pl.BlockSpec((tb, Fr), lambda i: (i, 0)),
        ),
        compiler_params=pltpu.CompilerParams(
            dimension_semantics=("parallel",),
            vmem_limit_bytes=vmem_bytes,
        ),
    )(x_r, a_r, b_r)

    return y_r.reshape(B, F) if kpack > 1 else y_r


# ---------------------------------------------------------------------------
# Transform classes (JAX mirrors of the PyTorch module hierarchy)
# ---------------------------------------------------------------------------
class InverseNotAvailable(Exception):
    """Exception to be thrown when a transform does not have an inverse."""


class Transform:
    """Base class for all transform objects."""

    def forward(self, inputs, context=None):
        raise NotImplementedError()

    def inverse(self, inputs, context=None):
        raise InverseNotAvailable()

    def __call__(self, inputs, context=None):
        return self.forward(inputs, context)


class PointwiseAffineTransform(Transform):
    """Concrete inner transform: y = x * scale + shift (per-feature params)."""

    def __init__(self, scale, shift, force_pallas=False):
        self.scale = jnp.asarray(scale)
        self.shift = jnp.asarray(shift)
        self.force_pallas = force_pallas

    def _logabsdet(self, batch, sign):
        # x-independent: computed once on the (F,) vector, broadcast to (B,).
        lad = sign * jnp.sum(jnp.log(jnp.abs(self.scale))).astype(jnp.float32)
        return jnp.full((batch,), lad, dtype=jnp.float32)

    def forward(self, inputs, context=None):
        y = _affine_pallas(inputs, self.scale, self.shift,
                           inverse=False, force_pallas=self.force_pallas)
        return y, self._logabsdet(inputs.shape[0], +1.0)

    def inverse(self, inputs, context=None):
        # Reciprocal hoisted out of the (serial) grid loop: computed once on
        # the (F,) vector here, passed to the kernel as the resident `a` block.
        inv_scale = 1.0 / self.scale
        y = _affine_pallas(inputs, inv_scale, self.shift,
                           inverse=True, force_pallas=self.force_pallas)
        return y, self._logabsdet(inputs.shape[0], -1.0)


class InverseTransform(Transform):
    """Creates a transform that is the inverse of a given transform."""
    # TODO(synk): InverseTransform itself is pure dispatch (no tensor compute);
    # the Pallas kernel lives in the concrete inner transform it wraps.

    def __init__(self, transform):
        self._transform = transform

    def forward(self, inputs, context=None):
        return self._transform.inverse(inputs, context)

    def inverse(self, inputs, context=None):
        return self._transform(inputs, context)


# ---------------------------------------------------------------------------
# Main
# ---------------------------------------------------------------------------
if __name__ == "__main__":
    key = jax.random.PRNGKey(0)
    kx, ks, kb, kx2 = jax.random.split(key, 4)

    # ---- case 1: narrow-feature demo shape (no-repack fallback path) ----
    batch, features = 2, 32
    x = jax.random.normal(kx, (batch, features), dtype=jnp.float32)
    scale = 0.5 + jax.random.uniform(ks, (features,), dtype=jnp.float32)
    shift = 0.1 * jax.random.normal(kb, (features,), dtype=jnp.float32)

    inner = PointwiseAffineTransform(scale, shift, force_pallas=True)
    inv_transform = InverseTransform(inner)

    # forward of InverseTransform == inverse of the inner affine transform
    y, logabsdet = inv_transform.forward(x)
    jax.block_until_ready((y, logabsdet))

    y_ref = (x - shift[None, :]) / scale[None, :]
    lad_ref = jnp.full((batch,), -jnp.sum(jnp.log(jnp.abs(scale))))
    assert jnp.allclose(y, y_ref, atol=1e-5, rtol=1e-5)
    assert jnp.allclose(logabsdet, lad_ref, atol=1e-5, rtol=1e-5)

    # Round-trip: inverse(forward(x)) recovers x.
    x_rt, _ = inv_transform.inverse(y)
    jax.block_until_ready(x_rt)
    assert jnp.allclose(x_rt, x, atol=1e-4, rtol=1e-4)

    # ---- case 2: exercise the lane-dense repack path (k=4, multi-step grid) --
    b2, f2 = 64, 96
    x2 = jax.random.normal(kx2, (b2, f2), dtype=jnp.float32)
    scale2 = 0.5 + jax.random.uniform(ks, (f2,), dtype=jnp.float32)
    shift2 = 0.1 * jax.random.normal(kb, (f2,), dtype=jnp.float32)
    inv2 = InverseTransform(
        PointwiseAffineTransform(scale2, shift2, force_pallas=True))
    y2, lad2 = inv2.forward(x2)
    jax.block_until_ready((y2, lad2))
    assert jnp.allclose(y2, (x2 - shift2[None, :]) / scale2[None, :],
                        atol=1e-5, rtol=1e-5)
    assert jnp.allclose(
        lad2, jnp.full((b2,), -jnp.sum(jnp.log(jnp.abs(scale2)))),
        atol=1e-5, rtol=1e-5)

    print("KERNEL_OK")
</pallas_src>

<mosaic_0001>
module attributes {stable_mosaic.version = 11 : i64} {
  func.func @kernel(%arg0: i32, %arg1: memref<2x32xf32, #tpu.memory_space<vmem>>, %arg2: memref<1x32xf32, #tpu.memory_space<vmem>>, %arg3: memref<1x32xf32, #tpu.memory_space<vmem>>, %arg4: memref<2x32xf32, #tpu.memory_space<vmem>>) attributes {dimension_semantics = [#tpu.dimension_semantics<parallel>], iteration_bounds = array<i64: 1>, scalar_prefetch = 0 : i64, scratch_operands = 0 : i64, tpu.core_type = #tpu.core_type<tc>, window_params = [{transform_indices = @transform_0, window_bounds = array<i64: 2, 32>}, {pipeline_mode = #tpu.pipeline_mode<synchronous>, transform_indices = @transform_1, window_bounds = array<i64: 1, 32>}, {pipeline_mode = #tpu.pipeline_mode<synchronous>, transform_indices = @transform_2, window_bounds = array<i64: 1, 32>}, {transform_indices = @transform_3, window_bounds = array<i64: 2, 32>}]} {
    %c0 = arith.constant 0 : index
    %c0_0 = arith.constant 0 : index
    %0 = vector.load %arg2[%c0, %c0_0] : memref<1x32xf32, #tpu.memory_space<vmem>>, vector<1x32xf32>
    %c0_1 = arith.constant 0 : index
    %c0_2 = arith.constant 0 : index
    %1 = vector.load %arg3[%c0_1, %c0_2] : memref<1x32xf32, #tpu.memory_space<vmem>>, vector<1x32xf32>
    %c0_3 = arith.constant 0 : index
    %c0_4 = arith.constant 0 : index
    %2 = vector.load %arg1[%c0_3, %c0_4] : memref<2x32xf32, #tpu.memory_space<vmem>>, vector<2x32xf32>
    %3 = vector.broadcast %1 : vector<1x32xf32> to vector<2x32xf32>
    %4 = arith.subf %2, %3 : vector<2x32xf32>
    %5 = vector.broadcast %0 : vector<1x32xf32> to vector<2x32xf32>
    %6 = arith.mulf %4, %5 : vector<2x32xf32>
    %c0_5 = arith.constant 0 : index
    %c0_6 = arith.constant 0 : index
    %7 = vector.load %arg4[%c0_5, %c0_6] : memref<2x32xf32, #tpu.memory_space<vmem>>, vector<2x32xf32>
    tpu.vector_store %arg4[%c0_5, %c0_6], %6 {strides = array<i32>} : memref<2x32xf32, #tpu.memory_space<vmem>>, vector<2x32xf32>,
    return
  }
  func.func @transform_0(%arg0: i32) -> (i32, i32) {
    %c0_i32 = arith.constant 0 : i32
    %c0_i32_0 = arith.constant 0 : i32
    return %arg0, %c0_i32 : i32, i32
  }
  func.func @transform_1(%arg0: i32) -> (i32, i32) {
    %c0_i32 = arith.constant 0 : i32
    %c0_i32_0 = arith.constant 0 : i32
    %c0_i32_1 = arith.constant 0 : i32
    return %c0_i32, %c0_i32_0 : i32, i32
  }
  func.func @transform_2(%arg0: i32) -> (i32, i32) {
    %c0_i32 = arith.constant 0 : i32
    %c0_i32_0 = arith.constant 0 : i32
    %c0_i32_1 = arith.constant 0 : i32
    return %c0_i32, %c0_i32_0 : i32, i32
  }
  func.func @transform_3(%arg0: i32) -> (i32, i32) {
    %c0_i32 = arith.constant 0 : i32
    %c0_i32_0 = arith.constant 0 : i32
    return %arg0, %c0_i32 : i32, i32
  }
}

</mosaic_0001>

<bundles_post_ra>
// kernel: tpu_custom_call.1
= control target key start
LH: loop header
LB: loop body
LE: loop exit
PB: predicated region body
PF: predicated region fallthrough
CT: control target
= control target key end

     0   :  { %8 = vsyncpa [#allocation3], 0  ;;  %s165_s0 = inlined_call_operand.hbm [shape: f32[2,32], index: 0, kind: input, shape index: {}]   ;;  %s166_s1 = inlined_call_operand.vmem [shape: f32[1,32], index: 1, kind: input, shape index: {}]   ;;  %s167_s2 = inlined_call_operand.vmem [shape: f32[1,32], index: 2, kind: input, shape index: {}]   ;;  %s168_s3 = inlined_call_operand.hbm [shape: f32[2,32], index: 3, kind: output, shape index: {}]  }
   0x1   :  { %9 = vsyncpa [#allocation4], 0  ;;  %s113_s12 = smov [#allocation2]   ;;  %s65_s16 = scalar_lea.hbm %s165_s0, 32 }
   0x2   :  { %s16_s13 = sshll.u32 %s113_s12, 4  ;;  %p66_p0 = scmp.ne.s32.totalorder %s165_s0, %s65_s16  ;;  %s17_s13 = int_to_ptr.vmem [resolvable:$true] %s16_s13 }
   0x3   :  { %p69_p1 = scmp.lt.u32.totalorder %s65_s16, %s165_s0 }
   0x5   :  { %p71_p2 = pnand %p69_p1, %p66_p0 }
   0x7   :  { %74 = shalt.err (!%p71_p2)
}
   0x8   :  { %s75_s21 = scalar_lea.vmem %s17_s13, 32  ;;  %p80_p4 = scmp.lt.s32.totalorder %s17_s13, %s17_s13 }
   0x9   :  { %p76_p3 = scmp.ne.s32.totalorder %s17_s13, %s75_s21  ;;  %p81_p5 = scmp.lt.s32.totalorder %s75_s21, %s75_s21 }
   0xb   :  { %p82_p6 = por %p81_p5, %p80_p4 }
   0xd   :  { %p83_p7 = pnand %p82_p6, %p76_p3 }
   0xf   :  { %86 = shalt.err (!%p83_p7)
}
  0x10   :  { %19 = dma.hbm_to_vmem [thread:$0]  %s165_s0, 32, %s17_s13, [#allocation3]  }
  0x11   :  { %109 = dma.done.wait [#allocation3], 32  }
  0x12   :  { %110 = vsyncadd [#allocation3], 4294967264  ;;  %s114_s24 = smov [#allocation5]   ;;  %v62_v0 = vld [vmem:[%s166_s1] ss:$0 sm:$0xff]  ;;  %vm44_vm0 = vcmask 254976  }
  0x13   :  { %s52_s25 = sshll.u32 %s114_s24, 4  ;;  %v61_v1 = vld [vmem:[%s167_s2] ss:$0 sm:$0xff]  ;;  %s53_s25 = int_to_ptr.vmem [resolvable:$true] %s52_s25 }
  0x14   :  { %v29_v2 = vld [vmem:[#allocation2] sm:$0x3]  ;;  %s87_s30 = scalar_lea.vmem %s53_s25, 32  ;;  %p92_p9 = scmp.lt.s32.totalorder %s53_s25, %s53_s25 }
  0x15   :  { %v36_v3 = vsub.f32 %v29_v2, %v61_v1  ;;  %p88_p8 = scmp.ne.s32.totalorder %s53_s25, %s87_s30  ;;  %p93_p10 = scmp.lt.s32.totalorder %s87_s30, %s87_s30 }
  0x17   :  { %v43_v4 = vmul.f32 %v62_v0, %v36_v3  ;;  %p94_p11 = por %p93_p10, %p92_p9 }
  0x19   :  { %45 = vst.msk [vmem:[#allocation5] sm:$0x3] %vm44_vm0, %v43_v4  ;;  %p95_p12 = pnand %p94_p11, %p88_p8 }
  0x1b   :  { %98 = shalt.err (!%p95_p12)
}
  0x1c   :  { %s99_s1 = scalar_lea.hbm %s168_s3, 32 }
  0x1d   :  { %p100_p13 = scmp.ne.s32.totalorder %s168_s3, %s99_s1  ;;  %p103_p0 = scmp.lt.u32.totalorder %s99_s1, %s168_s3 }
  0x1f   :  { %p105_p1 = pnand %p103_p0, %p100_p13 }
  0x21   :  { %108 = shalt.err (!%p105_p1)
}
  0x22   :  { %55 = dma.vmem_to_hbm [thread:$0]  %s53_s25, 32, %s168_s3, [#allocation4]  }
  0x23   :  { %111 = dma.done.wait [#allocation4], 32  }
  0x24   :  { %112 = vsyncadd [#allocation4], 4294967264 }
  0x25   :  { %59 = vsyncpa [#allocation3], 1 }
  0x26   :  { %60 = vsyncpa [#allocation4], 1 }

</bundles_post_ra>
